<compile_context>
chip_gen: v7x
topology: tpu7x:2x2x1
jax: 0.10.0
libtpu: 0.0.40
codegen_flags: <defaults>
</compile_context>

<pallas_src>
import math

import jax
import jax.numpy as jnp
from jax.experimental import pallas as pl
from jax.experimental.pallas import tpu as pltpu

# TokenType enum from synformer (END=0, START=1, REACTION=2, REACTANT=3)
TOKEN_END, TOKEN_START, TOKEN_REACTION, TOKEN_REACTANT = 0, 1, 2, 3
NUM_TOKEN_TYPES = 4
NEG_BIG = -1e30  # stand-in for -inf / -finfo.max in additive masks
VMEM_LIMIT_BYTES = 32 * 1024 * 1024  # explicit; re-derive for large d_model / v7x


# ----------------------------------------------------------------------------
# In-kernel helpers
# ----------------------------------------------------------------------------
def _ln(x, g, b):
    """LayerNorm over last dim (eps=1e-5, matches nn.LayerNorm default)."""
    mu = jnp.mean(x, axis=-1, keepdims=True)
    var = jnp.mean(jnp.square(x - mu), axis=-1, keepdims=True)
    return (x - mu) * jax.lax.rsqrt(var + 1e-5) * g + b


def _softmax_rows(s):
    """Numerically-stable softmax over the last axis (exact divide)."""
    s = s - jnp.max(s, axis=-1, keepdims=True)
    p = jnp.exp(s)
    return p / jnp.sum(p, axis=-1, keepdims=True)


def _split_heads(x2d, nhead, dh):
    """(T, D) -> (H, T, Dh) via lane slices stacked on a new leading axis."""
    return jnp.stack([x2d[:, h * dh:(h + 1) * dh] for h in range(nhead)], axis=0)


def _attention(q, k, v, mask, wo, bo, nhead, scale):
    """q:(S,D) k,v:(T,D) f32; mask broadcastable to (1,S,T); returns (S,D) f32."""
    D = q.shape[-1]
    dh = D // nhead
    qh = _split_heads(q * scale, nhead, dh).astype(jnp.bfloat16)   # (H,S,Dh)
    kh = _split_heads(k, nhead, dh).astype(jnp.bfloat16)            # (H,T,Dh)
    vh = _split_heads(v, nhead, dh).astype(jnp.bfloat16)            # (H,T,Dh)
    # batched scores over the head axis (leading batch dim)
    s = jax.lax.dot_general(qh, kh, (((2,), (2,)), ((0,), (0,))),
                            preferred_element_type=jnp.float32)     # (H,S,T)
    p = _softmax_rows(s + mask).astype(jnp.bfloat16)
    oh = jax.lax.dot_general(p, vh, (((2,), (1,)), ((0,), (0,))),
                             preferred_element_type=jnp.float32)    # (H,S,Dh)
    cat = jnp.concatenate([oh[h] for h in range(nhead)], axis=-1)   # (S,D)
    return jnp.dot(cat.astype(jnp.bfloat16), wo,
                   preferred_element_type=jnp.float32) + bo


# ----------------------------------------------------------------------------
# Pallas kernels
# ----------------------------------------------------------------------------
def _embed_kernel(fp_ref, tt_ref, rxn_ref, pe_ref, tok_tab_ref, rxn_tab_ref,
                  w1_ref, b1_ref, w2_ref, b2_ref, w3_ref, b3_ref, o_ref):
    """Fused: fp 3-layer MLP + in-kernel embedding gathers + select + PE."""
    fp = fp_ref[0].astype(jnp.bfloat16)                               # (S, F)
    tt = tt_ref[0]                                                    # (S, 1) i32
    rx = rxn_ref[0]                                                   # (S, 1) i32
    S = fp.shape[0]

    # fingerprint MLP (bf16 matmuls, f32 accumulation / bias / relu)
    h = jnp.maximum(
        jnp.dot(fp, w1_ref[...], preferred_element_type=jnp.float32) + b1_ref[...],
        0.0)
    h = jnp.maximum(
        jnp.dot(h.astype(jnp.bfloat16), w2_ref[...],
                preferred_element_type=jnp.float32) + b2_ref[...], 0.0)
    emb_fp = (jnp.dot(h.astype(jnp.bfloat16), w3_ref[...],
                      preferred_element_type=jnp.float32) + b3_ref[...])

    # embedding "gathers" as one-hot matmuls against the tiny resident tables
    nt = tok_tab_ref.shape[0]
    nr = rxn_tab_ref.shape[0]
    oh_tok = (jax.lax.broadcasted_iota(jnp.int32, (S, nt), 1) == tt
              ).astype(jnp.float32)
    oh_rxn = (jax.lax.broadcasted_iota(jnp.int32, (S, nr), 1) == rx
              ).astype(jnp.float32)
    emb_tok = jnp.dot(oh_tok, tok_tab_ref[...], preferred_element_type=jnp.float32)
    emb_rxn = jnp.dot(oh_rxn, rxn_tab_ref[...], preferred_element_type=jnp.float32)

    e = jnp.where(tt == TOKEN_REACTION, emb_rxn, emb_tok)
    e = jnp.where(tt == TOKEN_REACTANT, emb_fp, e)
    o_ref[0] = e + pe_ref[...]


def _make_decoder_kernel(nhead, d_model):
    dh = d_model // nhead
    scale = 1.0 / math.sqrt(dh)
    D = d_model
    bf16 = jnp.bfloat16

    def kernel(x_ref, mem_ref, tpad_ref, mpad_ref,
               ln1g, ln1b, wqkv, bqkv, wo1, bo1,
               ln2g, ln2b, wq2, bq2, wkv2, bkv2, wo2, bo2,
               ln3g, ln3b, fw1, fb1, fw2, fb2,
               o_ref, x_scr):
        layer = pl.program_id(1)

        @pl.when(layer == 0)
        def _():
            x_scr[...] = x_ref[0]                                     # (S, D)

        x = x_scr[...]
        S = x.shape[0]

        # ---- self-attention (pre-norm) -------------------------------------
        h = _ln(x, ln1g[0], ln1b[0]).astype(bf16)
        qkv = jnp.dot(h, wqkv[0], preferred_element_type=jnp.float32) + bqkv[0]
        q, k, v = qkv[:, :D], qkv[:, D:2 * D], qkv[:, 2 * D:]
        row = jax.lax.broadcasted_iota(jnp.int32, (S, S), 0)
        col = jax.lax.broadcasted_iota(jnp.int32, (S, S), 1)
        causal = jnp.where(col > row, NEG_BIG, 0.0).astype(jnp.float32)
        mask = (causal + tpad_ref[0])[None]                           # (1,S,S)
        x = x + _attention(q, k, v, mask, wo1[0], bo1[0], nhead, scale)

        # ---- cross-attention over `code` ------------------------------------
        h = _ln(x, ln2g[0], ln2b[0]).astype(bf16)
        m = mem_ref[0].astype(bf16)                                   # (Sk, D)
        q = jnp.dot(h, wq2[0], preferred_element_type=jnp.float32) + bq2[0]
        kv = jnp.dot(m, wkv2[0], preferred_element_type=jnp.float32) + bkv2[0]
        k, v = kv[:, :D], kv[:, D:]
        mask = mpad_ref[0][None]                                      # (1,1,Sk)
        x = x + _attention(q, k, v, mask, wo2[0], bo2[0], nhead, scale)

        # ---- feed-forward ----------------------------------------------------
        h = _ln(x, ln3g[0], ln3b[0]).astype(bf16)
        hid = jnp.maximum(
            jnp.dot(h, fw1[0], preferred_element_type=jnp.float32) + fb1[0], 0.0)
        y = jnp.dot(hid.astype(bf16), fw2[0],
                    preferred_element_type=jnp.float32) + fb2[0]
        x = x + y

        x_scr[...] = x

        @pl.when(layer == pl.num_programs(1) - 1)
        def _():
            o_ref[0] = x_scr[...]

    return kernel


# ----------------------------------------------------------------------------
# Kernel wrappers
# ----------------------------------------------------------------------------
def embed(params, token_types, rxn_indices, reactant_fps):
    B, S = token_types.shape
    D = params["d_model"]
    F = reactant_fps.shape[-1]
    DH = params["fp_w1"].shape[1]
    NT = params["tok_emb"].shape[0]
    NR = params["rxn_emb"].shape[0]
    tt = token_types[:, :, None].astype(jnp.int32)                    # (B,S,1)
    rx = rxn_indices[:, :, None].astype(jnp.int32)                    # (B,S,1)
    pe = params["pe"][:S, :]                                          # (S,D)

    perb3 = lambda shape: pl.BlockSpec(shape, lambda b: (b, 0, 0))
    fix2 = lambda shape: pl.BlockSpec(shape, lambda b: (0, 0))

    return pl.pallas_call(
        _embed_kernel,
        out_shape=jax.ShapeDtypeStruct((B, S, D), jnp.float32),
        grid=(B,),
        in_specs=[
            perb3((1, S, F)), perb3((1, S, 1)), perb3((1, S, 1)),
            fix2((S, D)), fix2((NT, D)), fix2((NR, D)),
            fix2((F, DH)), fix2((1, DH)),
            fix2((DH, DH)), fix2((1, DH)),
            fix2((DH, D)), fix2((1, D)),
        ],
        out_specs=perb3((1, S, D)),
        compiler_params=pltpu.CompilerParams(
            dimension_semantics=("parallel",),
            vmem_limit_bytes=VMEM_LIMIT_BYTES),
    )(reactant_fps, tt, rx, pe, params["tok_emb"], params["rxn_emb"],
      params["fp_w1"], params["fp_b1"], params["fp_w2"], params["fp_b2"],
      params["fp_w3"], params["fp_b3"])


def decoder_stack(x, memory, tgt_pad_add, mem_pad_add, params):
    """All decoder layers in one pallas_call: grid=(B, num_layers)."""
    B, S, D = x.shape
    Sk = memory.shape[1]
    lp = params["layers"]
    L = lp["wqkv"].shape[0]
    F = lp["fw1"].shape[2]
    H = params["nhead"]

    def bspec(shape):   # per-batch block, constant across the layer axis
        n = len(shape)
        return pl.BlockSpec(shape, lambda b, l, n=n: (b,) + (0,) * (n - 1))

    def lspec(shape):   # per-layer stacked weight block
        n = len(shape)
        return pl.BlockSpec(shape, lambda b, l, n=n: (l,) + (0,) * (n - 1))

    return pl.pallas_call(
        _make_decoder_kernel(H, D),
        out_shape=jax.ShapeDtypeStruct((B, S, D), jnp.float32),
        grid=(B, L),
        in_specs=[
            bspec((1, S, D)), bspec((1, Sk, D)),
            bspec((1, 1, S)), bspec((1, 1, Sk)),
            lspec((1, 1, D)), lspec((1, 1, D)),                 # ln1
            lspec((1, D, 3 * D)), lspec((1, 1, 3 * D)),          # qkv
            lspec((1, D, D)), lspec((1, 1, D)),                  # self out proj
            lspec((1, 1, D)), lspec((1, 1, D)),                  # ln2
            lspec((1, D, D)), lspec((1, 1, D)),                  # cross q
            lspec((1, D, 2 * D)), lspec((1, 1, 2 * D)),          # cross kv
            lspec((1, D, D)), lspec((1, 1, D)),                  # cross out proj
            lspec((1, 1, D)), lspec((1, 1, D)),                  # ln3
            lspec((1, D, F)), lspec((1, 1, F)),                  # ff1
            lspec((1, F, D)), lspec((1, 1, D)),                  # ff2
        ],
        out_specs=pl.BlockSpec((1, S, D), lambda b, l: (b, 0, 0)),
        scratch_shapes=[pltpu.VMEM((S, D), jnp.float32)],
        compiler_params=pltpu.CompilerParams(
            dimension_semantics=("parallel", "arbitrary"),
            vmem_limit_bytes=VMEM_LIMIT_BYTES),
    )(x, memory, tgt_pad_add, mem_pad_add,
      lp["ln1_g"], lp["ln1_b"], lp["wqkv"], lp["bqkv"], lp["wo1"], lp["bo1"],
      lp["ln2_g"], lp["ln2_b"], lp["wq2"], lp["bq2"], lp["wkv2"], lp["bkv2"],
      lp["wo2"], lp["bo2"],
      lp["ln3_g"], lp["ln3_b"], lp["fw1"], lp["fb1"], lp["fw2"], lp["fb2"])


def sinusoidal_pe(max_len, d_model):
    position = jnp.arange(max_len, dtype=jnp.float32)[:, None]
    div_term = jnp.exp(jnp.arange(0, d_model, 2, dtype=jnp.float32)
                       * (-math.log(10000.0) / d_model))
    pe = jnp.zeros((max_len, d_model), jnp.float32)
    pe = pe.at[:, 0::2].set(jnp.sin(position * div_term))
    pe = pe.at[:, 1::2].set(jnp.cos(position * div_term))
    return pe


def decoder_forward(params, code, code_padding_mask, token_types, rxn_indices,
                    reactant_fps, token_padding_mask):
    B, S = token_types.shape
    x = embed(params, token_types, rxn_indices, reactant_fps)

    # Tiny (B,1,S)/(B,1,Sk) additive key-padding rows; the (S,S) causal part is
    # generated inside the kernel from iota (no HBM mask stream).
    if token_padding_mask is not None:
        tgt_pad = jnp.where(token_padding_mask, NEG_BIG, 0.0).astype(jnp.float32)
    else:
        tgt_pad = jnp.zeros((B, S), jnp.float32)
    tgt_pad_add = tgt_pad[:, None, :]

    # TODO(synk): code=None (zero-length memory) path yields an empty softmax in
    # PyTorch (NaN); this kernel requires a non-empty `code`.
    mem_pad = jnp.where(code_padding_mask, NEG_BIG, 0.0).astype(jnp.float32)
    mem_pad_add = mem_pad[:, None, :]

    # output_norm=False -> no final LayerNorm
    return decoder_stack(x, code, tgt_pad_add, mem_pad_add, params)


# ----------------------------------------------------------------------------
# Deterministic parameter construction (stacked per-layer weights, bf16)
# ----------------------------------------------------------------------------
def init_params(key, d_model, nhead, dim_feedforward, num_layers, pe_max_len,
                fingerprint_dim, num_reaction_classes):
    D, F, L = d_model, dim_feedforward, num_layers
    dh_fp = d_model * 2
    ks = jax.random.split(key, 16)

    def w(k, shape, dtype=jnp.bfloat16):
        return (jax.random.normal(k, shape, jnp.float32) * 0.02).astype(dtype)

    p = {"d_model": D, "nhead": nhead}
    p["tok_emb"] = w(ks[0], (NUM_TOKEN_TYPES, D), jnp.float32)
    p["rxn_emb"] = w(ks[1], (num_reaction_classes, D), jnp.float32)
    p["fp_w1"] = w(ks[2], (fingerprint_dim, dh_fp))
    p["fp_b1"] = jnp.zeros((1, dh_fp), jnp.float32)
    p["fp_w2"] = w(ks[3], (dh_fp, dh_fp))
    p["fp_b2"] = jnp.zeros((1, dh_fp), jnp.float32)
    p["fp_w3"] = w(ks[4], (dh_fp, D))
    p["fp_b3"] = jnp.zeros((1, D), jnp.float32)
    p["pe"] = sinusoidal_pe(pe_max_len, D)

    ones = lambda: jnp.ones((L, 1, D), jnp.float32)
    zer = lambda n: jnp.zeros((L, 1, n), jnp.float32)
    p["layers"] = {
        "ln1_g": ones(), "ln1_b": zer(D),
        "wqkv": w(ks[5], (L, D, 3 * D)), "bqkv": zer(3 * D),
        "wo1": w(ks[6], (L, D, D)), "bo1": zer(D),
        "ln2_g": ones(), "ln2_b": zer(D),
        "wq2": w(ks[7], (L, D, D)), "bq2": zer(D),
        "wkv2": w(ks[8], (L, D, 2 * D)), "bkv2": zer(2 * D),
        "wo2": w(ks[9], (L, D, D)), "bo2": zer(D),
        "ln3_g": ones(), "ln3_b": zer(D),
        "fw1": w(ks[10], (L, D, F)), "fb1": zer(F),
        "fw2": w(ks[11], (L, F, D)), "fb2": zer(D),
    }
    return p


# ----------------------------------------------------------------------------
if __name__ == "__main__":
    # Small, module-consistent shapes.
    d_model, nhead, dim_ff, num_layers = 32, 4, 64, 2
    pe_max_len, fingerprint_dim, num_rxn = 16, 64, 10
    B, S, Sk = 2, 8, 6

    root = jax.random.PRNGKey(0)
    kp, k1, k2, k3, k4 = jax.random.split(root, 5)

    params = init_params(kp, d_model, nhead, dim_ff, num_layers, pe_max_len,
                         fingerprint_dim, num_rxn)

    token_types = jax.random.randint(k1, (B, S), 0, NUM_TOKEN_TYPES, jnp.int32)
    rxn_indices = jax.random.randint(k2, (B, S), 0, num_rxn, jnp.int32)
    reactant_fps = jax.random.normal(k3, (B, S, fingerprint_dim), jnp.float32)
    code = jax.random.normal(k4, (B, Sk, d_model), jnp.float32)
    code_padding_mask = jnp.zeros((B, Sk), jnp.bool_)
    token_padding_mask = jnp.zeros((B, S), jnp.bool_)

    y = decoder_forward(params, code, code_padding_mask, token_types,
                        rxn_indices, reactant_fps, token_padding_mask)
    y = jax.block_until_ready(y)

    assert y.shape == (B, S, d_model), y.shape
    assert bool(jnp.all(jnp.isfinite(y)))
    print("KERNEL_OK")
</pallas_src>

<mosaic_0001>
module attributes {stable_mosaic.version = 11 : i64} {
  func.func @_embed_kernel(%arg0: i32, %arg1: memref<1x8x64xf32, #tpu.memory_space<vmem>>, %arg2: memref<1x8x1xi32, #tpu.memory_space<vmem>>, %arg3: memref<1x8x1xi32, #tpu.memory_space<vmem>>, %arg4: memref<8x32xf32, #tpu.memory_space<vmem>>, %arg5: memref<4x32xf32, #tpu.memory_space<vmem>>, %arg6: memref<10x32xf32, #tpu.memory_space<vmem>>, %arg7: memref<64x64xbf16, #tpu.memory_space<vmem>>, %arg8: memref<1x64xf32, #tpu.memory_space<vmem>>, %arg9: memref<64x64xbf16, #tpu.memory_space<vmem>>, %arg10: memref<1x64xf32, #tpu.memory_space<vmem>>, %arg11: memref<64x32xbf16, #tpu.memory_space<vmem>>, %arg12: memref<1x32xf32, #tpu.memory_space<vmem>>, %arg13: memref<1x8x32xf32, #tpu.memory_space<vmem>>) attributes {dimension_semantics = [#tpu.dimension_semantics<parallel>], iteration_bounds = array<i64: 2>, scalar_prefetch = 0 : i64, scratch_operands = 0 : i64, tpu.core_type = #tpu.core_type<tc>, window_params = [{transform_indices = @transform_0, window_bounds = array<i64: 1, 8, 64>}, {transform_indices = @transform_1, window_bounds = array<i64: 1, 8, 1>}, {transform_indices = @transform_2, window_bounds = array<i64: 1, 8, 1>}, {pipeline_mode = #tpu.pipeline_mode<synchronous>, transform_indices = @transform_3, window_bounds = array<i64: 8, 32>}, {pipeline_mode = #tpu.pipeline_mode<synchronous>, transform_indices = @transform_4, window_bounds = array<i64: 4, 32>}, {pipeline_mode = #tpu.pipeline_mode<synchronous>, transform_indices = @transform_5, window_bounds = array<i64: 10, 32>}, {pipeline_mode = #tpu.pipeline_mode<synchronous>, transform_indices = @transform_6, window_bounds = array<i64: 64, 64>}, {pipeline_mode = #tpu.pipeline_mode<synchronous>, transform_indices = @transform_7, window_bounds = array<i64: 1, 64>}, {pipeline_mode = #tpu.pipeline_mode<synchronous>, transform_indices = @transform_8, window_bounds = array<i64: 64, 64>}, {pipeline_mode = #tpu.pipeline_mode<synchronous>, transform_indices = @transform_9, window_bounds = array<i64: 1, 64>}, {pipeline_mode = #tpu.pipeline_mode<synchronous>, transform_indices = @transform_10, window_bounds = array<i64: 64, 32>}, {pipeline_mode = #tpu.pipeline_mode<synchronous>, transform_indices = @transform_11, window_bounds = array<i64: 1, 32>}, {transform_indices = @transform_12, window_bounds = array<i64: 1, 8, 32>}]} {
    %c0 = arith.constant 0 : index
    %c0_0 = arith.constant 0 : index
    %c0_1 = arith.constant 0 : index
    %0 = vector.load %arg1[%c0, %c0_0, %c0_1] : memref<1x8x64xf32, #tpu.memory_space<vmem>>, vector<1x8x64xf32>
    %1 = vector.shape_cast %0 : vector<1x8x64xf32> to vector<8x64xf32>
    %2 = arith.truncf %1 : vector<8x64xf32> to vector<8x64xbf16>
    %c0_2 = arith.constant 0 : index
    %c0_3 = arith.constant 0 : index
    %c0_4 = arith.constant 0 : index
    %3 = vector.load %arg2[%c0_2, %c0_3, %c0_4] : memref<1x8x1xi32, #tpu.memory_space<vmem>>, vector<1x8x1xi32>
    %4 = vector.shape_cast %3 : vector<1x8x1xi32> to vector<8x1xi32>
    %c0_5 = arith.constant 0 : index
    %c0_6 = arith.constant 0 : index
    %c0_7 = arith.constant 0 : index
    %5 = vector.load %arg3[%c0_5, %c0_6, %c0_7] : memref<1x8x1xi32, #tpu.memory_space<vmem>>, vector<1x8x1xi32>
    %6 = vector.shape_cast %5 : vector<1x8x1xi32> to vector<8x1xi32>
    %c0_8 = arith.constant 0 : index
    %c0_9 = arith.constant 0 : index
    %7 = vector.load %arg7[%c0_8, %c0_9] : memref<64x64xbf16, #tpu.memory_space<vmem>>, vector<64x64xbf16>
    %cst = arith.constant dense<0.000000e+00> : vector<8x64xf32>
    %8 = tpu.matmul %2, %7, %cst {dimension_numbers = #tpu.dot_dimension_numbers<[1], [0], [0], [1], [0, 0, 1, 1], [], []>} : vector<8x64xbf16>, vector<64x64xbf16>, vector<8x64xf32> -> vector<8x64xf32>
    %c0_10 = arith.constant 0 : index
    %c0_11 = arith.constant 0 : index
    %9 = vector.load %arg8[%c0_10, %c0_11] : memref<1x64xf32, #tpu.memory_space<vmem>>, vector<1x64xf32>
    %10 = vector.broadcast %9 : vector<1x64xf32> to vector<8x64xf32>
    %11 = arith.addf %8, %10 : vector<8x64xf32>
    %cst_12 = arith.constant 0.000000e+00 : f32
    %12 = vector.broadcast %cst_12 : f32 to vector<8x64xf32>
    %13 = arith.maximumf %11, %12 : vector<8x64xf32>
    %14 = arith.truncf %13 : vector<8x64xf32> to vector<8x64xbf16>
    %c0_13 = arith.constant 0 : index
    %c0_14 = arith.constant 0 : index
    %15 = vector.load %arg9[%c0_13, %c0_14] : memref<64x64xbf16, #tpu.memory_space<vmem>>, vector<64x64xbf16>
    %cst_15 = arith.constant dense<0.000000e+00> : vector<8x64xf32>
    %16 = tpu.matmul %14, %15, %cst_15 {dimension_numbers = #tpu.dot_dimension_numbers<[1], [0], [0], [1], [0, 0, 1, 1], [], []>} : vector<8x64xbf16>, vector<64x64xbf16>, vector<8x64xf32> -> vector<8x64xf32>
    %c0_16 = arith.constant 0 : index
    %c0_17 = arith.constant 0 : index
    %17 = vector.load %arg10[%c0_16, %c0_17] : memref<1x64xf32, #tpu.memory_space<vmem>>, vector<1x64xf32>
    %18 = vector.broadcast %17 : vector<1x64xf32> to vector<8x64xf32>
    %19 = arith.addf %16, %18 : vector<8x64xf32>
    %cst_18 = arith.constant 0.000000e+00 : f32
    %20 = vector.broadcast %cst_18 : f32 to vector<8x64xf32>
    %21 = arith.maximumf %19, %20 : vector<8x64xf32>
    %22 = arith.truncf %21 : vector<8x64xf32> to vector<8x64xbf16>
    %c0_19 = arith.constant 0 : index
    %c0_20 = arith.constant 0 : index
    %23 = vector.load %arg11[%c0_19, %c0_20] : memref<64x32xbf16, #tpu.memory_space<vmem>>, vector<64x32xbf16>
    %cst_21 = arith.constant dense<0.000000e+00> : vector<8x32xf32>
    %24 = tpu.matmul %22, %23, %cst_21 {dimension_numbers = #tpu.dot_dimension_numbers<[1], [0], [0], [1], [0, 0, 1, 1], [], []>} : vector<8x64xbf16>, vector<64x32xbf16>, vector<8x32xf32> -> vector<8x32xf32>
    %c0_22 = arith.constant 0 : index
    %c0_23 = arith.constant 0 : index
    %25 = vector.load %arg12[%c0_22, %c0_23] : memref<1x32xf32, #tpu.memory_space<vmem>>, vector<1x32xf32>
    %26 = vector.broadcast %25 : vector<1x32xf32> to vector<8x32xf32>
    %27 = arith.addf %24, %26 : vector<8x32xf32>
    %28 = tpu.iota {dimensions = array<i32: 1>} : vector<8x4xi32>
    %29 = vector.broadcast %4 : vector<8x1xi32> to vector<8x4xi32>
    %30 = arith.cmpi eq, %28, %29 : vector<8x4xi32>
    %31 = arith.extui %30 : vector<8x4xi1> to vector<8x4xi32>
    %32 = arith.sitofp %31 : vector<8x4xi32> to vector<8x4xf32>
    %33 = tpu.iota {dimensions = array<i32: 1>} : vector<8x10xi32>
    %34 = vector.broadcast %6 : vector<8x1xi32> to vector<8x10xi32>
    %35 = arith.cmpi eq, %33, %34 : vector<8x10xi32>
    %36 = arith.extui %35 : vector<8x10xi1> to vector<8x10xi32>
    %37 = arith.sitofp %36 : vector<8x10xi32> to vector<8x10xf32>
    %c0_24 = arith.constant 0 : index
    %c0_25 = arith.constant 0 : index
    %38 = vector.load %arg5[%c0_24, %c0_25] : memref<4x32xf32, #tpu.memory_space<vmem>>, vector<4x32xf32>
    %cst_26 = arith.constant dense<0.000000e+00> : vector<8x32xf32>
    %39 = tpu.matmul %32, %38, %cst_26 {dimension_numbers = #tpu.dot_dimension_numbers<[1], [0], [0], [1], [0, 0, 1, 1], [], []>} : vector<8x4xf32>, vector<4x32xf32>, vector<8x32xf32> -> vector<8x32xf32>
    %c0_27 = arith.constant 0 : index
    %c0_28 = arith.constant 0 : index
    %40 = vector.load %arg6[%c0_27, %c0_28] : memref<10x32xf32, #tpu.memory_space<vmem>>, vector<10x32xf32>
    %cst_29 = arith.constant dense<0.000000e+00> : vector<8x32xf32>
    %41 = tpu.matmul %37, %40, %cst_29 {dimension_numbers = #tpu.dot_dimension_numbers<[1], [0], [0], [1], [0, 0, 1, 1], [], []>} : vector<8x10xf32>, vector<10x32xf32>, vector<8x32xf32> -> vector<8x32xf32>
    %c2_i32 = arith.constant 2 : i32
    %42 = vector.broadcast %c2_i32 : i32 to vector<8x1xi32>
    %43 = arith.cmpi eq, %4, %42 : vector<8x1xi32>
    %44 = vector.shape_cast %43 : vector<8x1xi1> to vector<8x1xi1>
    %45 = vector.broadcast %44 : vector<8x1xi1> to vector<8x32xi1>
    %46 = arith.select %45, %41, %39 : vector<8x32xi1>, vector<8x32xf32>
    %c3_i32 = arith.constant 3 : i32
    %47 = vector.broadcast %c3_i32 : i32 to vector<8x1xi32>
    %48 = arith.cmpi eq, %4, %47 : vector<8x1xi32>
    %49 = vector.shape_cast %48 : vector<8x1xi1> to vector<8x1xi1>
    %50 = vector.broadcast %49 : vector<8x1xi1> to vector<8x32xi1>
    %51 = arith.select %50, %27, %46 : vector<8x32xi1>, vector<8x32xf32>
    %c0_30 = arith.constant 0 : index
    %c0_31 = arith.constant 0 : index
    %52 = vector.load %arg4[%c0_30, %c0_31] : memref<8x32xf32, #tpu.memory_space<vmem>>, vector<8x32xf32>
    %53 = arith.addf %51, %52 : vector<8x32xf32>
    %c0_32 = arith.constant 0 : index
    %c0_33 = arith.constant 0 : index
    %c0_34 = arith.constant 0 : index
    %54 = vector.load %arg13[%c0_32, %c0_33, %c0_34] : memref<1x8x32xf32, #tpu.memory_space<vmem>>, vector<1x8x32xf32>
    %55 = vector.shape_cast %54 : vector<1x8x32xf32> to vector<8x32xf32>
    %56 = vector.shape_cast %53 : vector<8x32xf32> to vector<1x8x32xf32>
    tpu.vector_store %arg13[%c0_32, %c0_33, %c0_34], %56 {strides = array<i32>} : memref<1x8x32xf32, #tpu.memory_space<vmem>>, vector<1x8x32xf32>,
    return
  }
  func.func @transform_0(%arg0: i32) -> (i32, i32, i32) {
    %c0_i32 = arith.constant 0 : i32
    %c0_i32_0 = arith.constant 0 : i32
    %c0_i32_1 = arith.constant 0 : i32
    return %arg0, %c0_i32, %c0_i32_0 : i32, i32, i32
  }
  func.func @transform_1(%arg0: i32) -> (i32, i32, i32) {
    %c0_i32 = arith.constant 0 : i32
    %c0_i32_0 = arith.constant 0 : i32
    %c0_i32_1 = arith.constant 0 : i32
    return %arg0, %c0_i32, %c0_i32_0 : i32, i32, i32
  }
  func.func @transform_2(%arg0: i32) -> (i32, i32, i32) {
    %c0_i32 = arith.constant 0 : i32
    %c0_i32_0 = arith.constant 0 : i32
    %c0_i32_1 = arith.constant 0 : i32
    return %arg0, %c0_i32, %c0_i32_0 : i32, i32, i32
  }
  func.func @transform_3(%arg0: i32) -> (i32, i32) {
    %c0_i32 = arith.constant 0 : i32
    %c0_i32_0 = arith.constant 0 : i32
    %c0_i32_1 = arith.constant 0 : i32
    return %c0_i32, %c0_i32_0 : i32, i32
  }
  func.func @transform_4(%arg0: i32) -> (i32, i32) {
    %c0_i32 = arith.constant 0 : i32
    %c0_i32_0 = arith.constant 0 : i32
    %c0_i32_1 = arith.constant 0 : i32
    return %c0_i32, %c0_i32_0 : i32, i32
  }
  func.func @transform_5(%arg0: i32) -> (i32, i32) {
    %c0_i32 = arith.constant 0 : i32
    %c0_i32_0 = arith.constant 0 : i32
    %c0_i32_1 = arith.constant 0 : i32
    return %c0_i32, %c0_i32_0 : i32, i32
  }
  func.func @transform_6(%arg0: i32) -> (i32, i32) {
    %c0_i32 = arith.constant 0 : i32
    %c0_i32_0 = arith.constant 0 : i32
    %c0_i32_1 = arith.constant 0 : i32
    return %c0_i32, %c0_i32_0 : i32, i32
  }
  func.func @transform_7(%arg0: i32) -> (i32, i32) {
    %c0_i32 = arith.constant 0 : i32
    %c0_i32_0 = arith.constant 0 : i32
    %c0_i32_1 = arith.constant 0 : i32
    return %c0_i32, %c0_i32_0 : i32, i32
  }
  func.func @transform_8(%arg0: i32) -> (i32, i32) {
    %c0_i32 = arith.constant 0 : i32
    %c0_i32_0 = arith.constant 0 : i32
    %c0_i32_1 = arith.constant 0 : i32
    return %c0_i32, %c0_i32_0 : i32, i32
  }
  func.func @transform_9(%arg0: i32) -> (i32, i32) {
    %c0_i32 = arith.constant 0 : i32
    %c0_i32_0 = arith.constant 0 : i32
    %c0_i32_1 = arith.constant 0 : i32
    return %c0_i32, %c0_i32_0 : i32, i32
  }
  func.func @transform_10(%arg0: i32) -> (i32, i32) {
    %c0_i32 = arith.constant 0 : i32
    %c0_i32_0 = arith.constant 0 : i32
    %c0_i32_1 = arith.constant 0 : i32
    return %c0_i32, %c0_i32_0 : i32, i32
  }
  func.func @transform_11(%arg0: i32) -> (i32, i32) {
    %c0_i32 = arith.constant 0 : i32
    %c0_i32_0 = arith.constant 0 : i32
    %c0_i32_1 = arith.constant 0 : i32
    return %c0_i32, %c0_i32_0 : i32, i32
  }
  func.func @transform_12(%arg0: i32) -> (i32, i32, i32) {
    %c0_i32 = arith.constant 0 : i32
    %c0_i32_0 = arith.constant 0 : i32
    %c0_i32_1 = arith.constant 0 : i32
    return %arg0, %c0_i32, %c0_i32_0 : i32, i32, i32
  }
}

</mosaic_0001>

<bundles_post_ra>
// kernel: tpu_custom_call.1
= control target key start
LH: loop header
LB: loop body
LE: loop exit
PB: predicated region body
PF: predicated region fallthrough
CT: control target
= control target key end

     0   :  { %s1810_s0 = inlined_call_operand.hbm [shape: f32[2,8,64], index: 0, kind: input, shape index: {}]   ;;  %s1811_s1 = inlined_call_operand.vmem [shape: s32[2,8,1], index: 1, kind: input, shape index: {}]   ;;  %s1812_s2 = inlined_call_operand.vmem [shape: s32[2,8,1], index: 2, kind: input, shape index: {}]   ;;  %s1813_s3 = inlined_call_operand.hbm [shape: f32[8,32], index: 3, kind: input, shape index: {}]   ;;  %s1814_s4 = inlined_call_operand.hbm [shape: f32[4,32], index: 4, kind: input, shape index: {}]   ;;  %s1815_s5 = inlined_call_operand.vmem [shape: f32[10,32], index: 5, kind: input, shape index: {}]   ;;  %s1816_s6 = inlined_call_operand.vmem [shape: bf16[64,64], index: 6, kind: input, shape index: {}]   ;;  %s1817_s7 = inlined_call_operand.vmem [shape: f32[1,64], index: 7, kind: input, shape index: {}]   ;;  %s1818_s8 = inlined_call_operand.vmem [shape: bf16[64,64], index: 8, kind: input, shape index: {}]   ;;  %s1819_s9 = inlined_call_operand.vmem [shape: f32[1,64], index: 9, kind: input, shape index: {}]   ;;  %s1820_s10 = inlined_call_operand.vmem [shape: bf16[64,32], index: 10, kind: input, shape index: {}]   ;;  %s1821_s11 = inlined_call_operand.vmem [shape: f32[1,32], index: 11, kind: input, shape index: {}]   ;;  %s1822_s12 = inlined_call_operand.hbm [shape: f32[2,8,32], index: 12, kind: output, shape index: {}]  }
   0x1   :  { %1829 = sst [smem:[#allocation14_spill]] %s1813_s3 }
   0x2   :  { %1830 = sst [smem:[#allocation15_spill]] %s1822_s12 }
   0x3   :  { %17 = vsyncpa [#allocation3], 0 }
   0x4   :  { %19 = vsyncpa [#allocation3 + $0x1], 0 }
   0x5   :  { %20 = vsyncpa [#allocation6], 0 }
   0x6   :  { %21 = vsyncpa [#allocation4], 0 }
   0x7   :  { %23 = vsyncpa [#allocation4 + $0x1], 0  ;;  %s1494_s21 = smov 0   ;;  %s1496_s22 = smov 0  }
   0x8   :  { %s1498_s23 = smov 0   ;;  %s1500_s24 = smov 0  }
   0x9 LB: > { %1831 = sst [smem:[#allocation12_spill]] %s1406_s21  ;;  %s1515_s25 = sadd.s32 4294967295, %s1418_s24   ;;  %s1418_s24 = sphi %s1500_s24, %s1854_s24   ;;  %s1414_s23 = sphi %s1498_s23, %s1853_s23   ;;  %s1410_s22 = sphi %s1496_s22, %s1852_s22   ;;  %s1406_s21 = sphi %s1494_s21, %s1851_s21  }
   0xa   : > { %s1062_s26 = sadd.s32 4294967294, %s1418_s24   ;;  %p49_p0 = scmp.ne.s32.totalorder %s1410_s22, %s1406_s21 }
   0xb   : > { %p1825_p1 = scmp.eq.s32.totalorder %s1515_s25, 0  ;;  %p320_p3 = scmp.eq.s32.totalorder %s1062_s26, 1 }
   0xc   : > { %p1063_p5 = scmp.ge.s32.totalorder %s1418_s24, 1  ;;  %p327_p7 = scmp.lt.s32.totalorder %s1418_s24, 3 }
   0xd   : > { %p1524_p4 = por %p1825_p1, %p49_p0  ;;  %p1529_p6 = por %p320_p3, %p49_p0 }
   0xe   : > { %p1534_p8 = pnand %p1063_p5, %p327_p7  ;;  %s1420_s30 = smov [#allocation5]  }
   0xf   : > { %s1832_s27 = scalar_select %p1524_p4, 1, 0 }
  0x10   : > { %s1833_s28 = scalar_select %p1529_p6, 1, 0 }
  0x11   : > { %s1835_s29 = scalar_select %p1534_p8, 1, 0 }
  0x12   : > { %1834 = sst [smem:[#allocation13_spill]] %s1833_s28  ;;  %s340_s13 = sshll.u32 %s1420_s30, 4  ;;  %s341_s13 = int_to_ptr.vmem [resolvable:$true] %s340_s13 }
  0x13   : > { %p1188_p10 = pneg %p1534_p8  ;;  %s1421_s14 = smov [#allocation7]  }
  0x14   : > { %s351_s15 = sshll.u32 %s1421_s14, 4  ;;  %s1550_s17 = sadd.s32 1, %s1418_s24   ;;  %s1547_s15 = int_to_ptr.vmem [resolvable:$true] %s351_s15 }
  0x15   : > { %p1543_p11 = pnand %p1188_p10, %p1825_p1  ;;  %s1837_s3 = sld [smem:[#allocation14_spill]] }
  0x17   : > { %p1264_p13 = pneg %p1543_p11 }
  0x1b   : > { %s1262_s26 = scalar_lea.hbm %s1837_s3, 128 }
  0x1c   : > { %p1263_p12 = scmp.ne.s32.totalorder %s1837_s3, %s1262_s26  ;;  %p1269_p5 = scmp.lt.u32.totalorder %s1262_s26, %s1837_s3 }
  0x1e   : > { %p1265_p0 = pnand %p1264_p13, %p1263_p12 }
  0x20   : > { %p1266_p3 = pneg %p1265_p0 }
  0x22   : > { %p1271_p7 = pnand %p1269_p5, %p1266_p3 }
  0x24   : > { %1274 = shalt.err (!%p1271_p7)
}
  0x25   : > { %s1275_s18 = scalar_lea.vmem %s341_s13, 128  ;;  %p1283_p2 = scmp.lt.s32.totalorder %s341_s13, %s341_s13 }
  0x26   : > { %p1276_p10 = scmp.ne.s32.totalorder %s341_s13, %s1275_s18  ;;  %p1284_p6 = scmp.lt.s32.totalorder %s1275_s18, %s1275_s18 }
  0x28   : > { %p1278_p9 = pnand %p1276_p10, %p1264_p13  ;;  %p1285_p4 = por %p1284_p6, %p1283_p2 }
  0x2a   : > { %p1279_p1 = pneg %p1278_p9 }
  0x2c   : > { %p1286_p8 = pnand %p1285_p4, %p1279_p1 }
  0x2e   : > { %1289 = shalt.err (!%p1286_p8)
}
  0x2f   : > { %1191 = dma.hbm_to_vmem [thread:$0]  (!%p1543_p11), %s1837_s3, 128, %s341_s13, [#allocation6]  }
  0x30   : > { %s1290_s26 = scalar_lea.hbm %s1814_s4, 64 }
  0x31   : > { %p1291_p9 = scmp.ne.s32.totalorder %s1814_s4, %s1290_s26  ;;  %p1297_p4 = scmp.lt.u32.totalorder %s1290_s26, %s1814_s4 }
  0x33   : > { %p1293_p2 = pnand %p1291_p9, %p1264_p13 }
  0x35   : > { %p1294_p1 = pneg %p1293_p2 }
  0x37   : > { %p1299_p6 = pnand %p1297_p4, %p1294_p1 }
  0x39   : > { %1302 = shalt.err (!%p1299_p6)
}
  0x3a   : > { %s1303_s13 = scalar_lea.vmem %s1547_s15, 64  ;;  %p1311_p3 = scmp.lt.s32.totalorder %s1547_s15, %s1547_s15 }
  0x3b   : > { %p1304_p8 = scmp.ne.s32.totalorder %s1547_s15, %s1303_s13  ;;  %p1312_p5 = scmp.lt.s32.totalorder %s1303_s13, %s1303_s13 }
  0x3d   : > { %p1306_p12 = pnand %p1304_p8, %p1264_p13  ;;  %p1313_p7 = por %p1312_p5, %p1311_p3 }
  0x3f   : > { %p1307_p0 = pneg %p1306_p12 }
  0x41   : > { %p1314_p10 = pnand %p1313_p7, %p1307_p0 }
  0x43   : > { %1317 = shalt.err (!%p1314_p10)
}
  0x44   : > { %1194 = dma.hbm_to_vmem [thread:$0]  (!%p1543_p11), %s1814_s4, 64, %s1547_s15, [#allocation6]  }
  0x45   : > { %s1838_s19 = ssub.s32 %s1418_s24, %s1550_s17  ;;  %s36_s21 = sadd.s32 1, %s1414_s23 }
  0x46   : > { %p34_p13 = scmp.eq.s32.totalorder %s1838_s19, 0  ;;  %p43_p9 = scmp.ne.s32.totalorder %s1414_s23, %s1410_s22 }
  0x47   : > { %p44_p2 = scmp.eq.s32.totalorder %s1418_s24, 0  ;;  %p1839_p4 = scmp.eq.s32.totalorder %s1515_s25, 1 }
  0x48   : > { %s1609_s16 = scalar_select %p34_p13, %s1414_s23, %s36_s21  }
  0x49   : > { %p45_p1 = por %p44_p2, %p43_p9  ;;  %p1613_p6 = por %p1839_p4, %p43_p9 }
  0x4a   : > { %p1205_p8 = scmp.lt.s32.totalorder %s1418_s24, 2  ;;  %s383_s26 = sand.u32 1, %s1414_s23  }
  0x4b   : > { %s1067_s30 = sshll.u32 %s383_s26, 3  ;;  %s1068_s14 = sshll.u32 %s1418_s24, 7 }
  0x4c   : > { %s1623_s15 = scalar_lea.hbm %s1810_s0, %s1068_s14  ;;  %s387_s12 = scalar_lea.vmem [#allocation2], %s1067_s30 }
  0x4d   : > { %s394_s28 = sshll.u32 %s387_s12, 4  ;;  %p1627_p11 = pnand %p1205_p8, %p45_p1  ;;  %s1625_s28 = int_to_ptr.vmem [resolvable:$true] %s394_s28 }
  0x4e   : > { %s384_s21 = scalar_lea.sflag [#allocation3], %s383_s26  ;;  %s1318_s3 = scalar_lea.hbm %s1623_s15, 128 }
  0x4f   : > { %p1319_p12 = scmp.ne.s32.totalorder %s1623_s15, %s1318_s3  ;;  %p1320_p0 = pneg %p1627_p11 }
  0x50   : > { %s1323_s18 = scalar_lea.hbm %s1810_s0, 256  ;;  %p1324_p7 = scmp.lt.u32.totalorder %s1623_s15, %s1810_s0 }
  0x51   : > { %p1321_p3 = pnand %p1320_p0, %p1319_p12  ;;  %p1325_p10 = scmp.lt.u32.totalorder %s1323_s18, %s1318_s3 }
  0x52   : > { %p1327_p9 = scmp.lt.u32.totalorder %s1318_s3, %s1623_s15 }
  0x53   : > { %p1322_p5 = pneg %p1321_p3  ;;  %p1326_p13 = por %p1325_p10, %p1324_p7 }
  0x55   : > { %p1328_p2 = por %p1327_p9, %p1326_p13 }
  0x57   : > { %p1329_p1 = pnand %p1328_p2, %p1322_p5 }
  0x59   : > { %1332 = shalt.err (!%p1329_p1)
}
  0x5a   : > { %s1333_s26 = scalar_lea.vmem %s1625_s28, 128  ;;  %s1422_s14 = smov [#allocation2]  }
  0x5b   : > { %p1334_p4 = scmp.ne.s32.totalorder %s1625_s28, %s1333_s26  ;;  %s1338_s30 = sshll.u32 %s1422_s14, 4  ;;  %s1339_s30 = int_to_ptr.vmem [resolvable:$false] %s1338_s30 }
  0x5c   : > { %s1340_s13 = scalar_lea.vmem %s1339_s30, 256  ;;  %p1341_p3 = scmp.lt.s32.totalorder %s1625_s28, %s1339_s30 }
  0x5d   : > { %p1336_p8 = pnand %p1334_p4, %p1320_p0  ;;  %p1342_p7 = scmp.lt.s32.totalorder %s1340_s13, %s1333_s26 }
  0x5f   : > { %p1337_p12 = pneg %p1336_p8  ;;  %p1343_p10 = por %p1342_p7, %p1341_p3 }
  0x61   : > { %p1344_p13 = pnand %p1343_p10, %p1337_p12 }
  0x63   : > { %1347 = shalt.err (!%p1344_p13)
}
  0x64   : > { %1198 = dma.hbm_to_vmem [thread:$0]  (!%p1627_p11), %s1623_s15, 128, %s1625_s28, %s384_s21  }
  0x65   : > { %p1842_p5 = scmp.ne.s32.totalorder %s1835_s29, 0 }
  0x66   : > { %s1659_s3 = sand.u32 (!%p1842_p5), 1, %s1410_s22   ;;  %p1843_p0 = scmp.ne.s32.totalorder (!%p1842_p5), %s1832_s27, 0 }
  0x67   : > { %417 = sbr.rel (%p1842_p5) target bundleno = 799 (0x31f), region = 68  ;;  %s1070_s18 = sshll.u32 (!%p1842_p5), %s1659_s3, 3 }
  0x68   : > { %s420_s12 = scalar_lea.sflag (!%p1842_p5), [#allocation3], %s1659_s3  ;;  %s423_s26 = scalar_lea.vmem (!%p1842_p5), [#allocation2], %s1070_s18 }
  0x6e   : > { %1393 = dma.done.wait (%p1843_p0), %s420_s12, 128  }
  0x6f   : > { %1395 = vsyncadd (%p1843_p0), %s420_s12, 4294967168  ;;  %p1844_p11 = scmp.eq.s32.totalorder %s1515_s25, 0 }
  0x71   : > { %1397 = dma.done.wait (%p1844_p11), [#allocation6], 192   ;;  %p1845_p9 = pmov %p1844_p11 }
  0x72   : > { %v1423_v0 = vmov 0.0   ;;  %vm1424_vm0 = vmmov 0   ;;  %v1250_v1 = vld [vmem:[%s1816_s6] sm:$0xff]   ;;  %v1251_v2 = vld [vmem:[%s1816_s6 + $0x8] sm:$0xff]   ;;  %v1252_v4 = vld [vmem:[%s1816_s6 + $0x10] sm:$0xff]   ;;  %vm532_vm1 = vcmask 523264   ;;  %v744_v25 = vlaneseq }
  0x73   : > { %1399 = vsyncadd (%p1845_p9), [#allocation6], 4294967104  ;;  %1124 = vmatprep.subr.bf16.mxu0 %v1423_v0  ;;  %1132 = vmatprep.mubr.msk.bf16.mxu0 %vm1424_vm0, %v1423_v0  ;;  %v1254_v3 = vld [vmem:[%s1818_s8] sm:$0xff]   ;;  %v1255_v5 = vld [vmem:[%s1818_s8 + $0x8] sm:$0xff]   ;;  %p480_p2 = scmp.lt.s32.totalorder %s1515_s25, 1  ;;  %v1425_v12 = vmov 0  }
  0x74   : > { %1136 = vmatprep.subr.bf16.mxu1 %v1423_v0  ;;  %1144 = vmatprep.mubr.msk.bf16.mxu1 %vm1424_vm0, %v1423_v0  ;;  %v1253_v6 = vld [vmem:[%s1816_s6 + $0x18] sm:$0xff]   ;;  %v489_v7 = vld [vmem:[%s423_s26] sm:$0xff]  ;;  %v1256_v9 = vld [vmem:[%s1818_s8 + $0x10] sm:$0xff]   ;;  %vm763_vm2 = vcmask 1043456   ;;  %v1426_v26 = vmov 0.0|0.0   ;;  %v745_v27 = vand.u32 127, %v744_v25 }
  0x75   : > { %1125 = vmatpush3.bf16.msra.mxu0 %v1250_v1  ;;  %1137 = vmatpush3.bf16.msra.mxu1 %v1254_v3  ;;  %v490_v8 = vpack.c.bf16 %v489_v7, %v489_v7  ;;  %v1257_v10 = vld [vmem:[%s1818_s8 + $0x18] sm:$0xff]   ;;  %v1258_v11 = vld [vmem:[%s1820_s10] sm:$0xff]   ;;  %s481_s30 = scalar_select %p480_p2, %s1515_s25, 1  ;;  %v1259_v15 = vld [vmem:[%s1820_s10 + $0x8] sm:$0xff]   ;;  %vm759_vm3 = vcmask 31744   ;;  %vm843_vm6 = vcmask 1041408  }
  0x76   : > { %1126 = vmatprep.subr.bf16.mxu0 %v1423_v0  ;;  %1138 = vmatprep.subr.bf16.mxu1 %v1423_v0  ;;  %v1076_v16 = vld [vmem:[%s1817_s7] ss:$0 sm:$0xff]  ;;  %v758_v24 = vld [vmem:[#allocation7] sm:$0xf]  ;;  %v838_v32 = vld [vmem:[%s1815_s5 + $0x8] sm:$0x3] }
  0x77   : > { %1248 = vset.pattern.permute.xlu0 %v1425_v12  ;;  %1249 = vset.pattern.permute.xlu1 %v1425_v12  ;;  %s1074_s13 = sshll.u32 %s481_s30, 3  ;;  %v837_v31 = vld [vmem:[%s1815_s5] sm:$0xff]  ;;  %v1260_v33 = vld [vmem:[%s1820_s10 + $0x10] sm:$0xff]   ;;  %vm1427_vm7 = vmmov 1   ;;  %vm839_vm9 = vcmask 80896   ;;  %v1261_v36 = vld [vmem:[%s1820_s10 + $0x18] sm:$0xff]  }
  0x78   : > { %s483_s29 = scalar_lea.vmem %s1811_s1, %s1074_s13  ;;  %s487_s26 = scalar_lea.vmem %s1812_s2, %s1074_s13  ;;  %v1173_v34 = vpack.c.bf16 %v838_v32, %v837_v31  ;;  %vm1174_vm8 = vmpackc.low %vm843_vm6, %vm1427_vm7  ;;  %v1082_v39 = vld [vmem:[%s1819_s9] ss:$0 sm:$0xff]  ;;  %v931_v57 = vld [vmem:[#allocation5] sm:$0xff]  ;;  %vm933_vm14 = vcmask 261120  }
  0x79   : > { %1127 = vmatpush3.bf16.msra.mxu0 %v1251_v2  ;;  %1139 = vmatpush3.bf16.msra.mxu1 %v1255_v5  ;;  %v491_v13 = vld [vmem:[%s483_s29] sm:$0xff]  ;;  %s1101_s12 = sshll.u32 %s1515_s25, 7  ;;  %s479_s27 = scalar_lea.vmem [#allocation8], %s1070_s18 }
  0x7a   : > { %1128 = vmatprep.subr.bf16.mxu0 %v1423_v0  ;;  %1140 = vmatprep.subr.bf16.mxu1 %v1423_v0  ;;  %v492_v14 = vld [vmem:[%s487_s26] sm:$0xff]  ;;  %vm917_vm10 = vcmp.eq.s32.totalorder %v491_v13, 2  ;;  %vm924_vm11 = vcmp.eq.s32.totalorder %v491_v13, 3  ;;  %s949_s29 = sshll.u32 %s479_s27, 4  ;;  %s1846_s26 = sld [smem:[#allocation15_spill]]  ;;  %s1768_s29 = int_to_ptr.vmem [resolvable:$true] %s949_s29 }
  0x7b   : > { %747 = vperm.xlu0 %1248, %v491_v13   ;;  %v918_v37 = vsel %vm917_vm10, 1, %v1425_v12  ;;  %v925_v38 = vsel %vm924_vm11, 1, %v1425_v12  ;;  %v1088_v53 = vld [vmem:[%s1821_s11] ss:$0 sm:$0xff]  ;;  %s936_s25 = scalar_lea.sflag [#allocation4], %s1659_s3  ;;  %s1348_s18 = scalar_lea.vmem %s1768_s29, 128 }
  0x7c   : > { %920 = vperm.xlu1 %1249, %v918_v37   ;;  %p1349_p1 = scmp.ne.s32.totalorder %s1768_s29, %s1348_s18  ;;  %s1428_s21 = smov [#allocation8]  }
  0x7d   : > { %1129 = vmatpush3.bf16.msra.mxu0 %v1252_v4  ;;  %1141 = vmatpush3.bf16.msra.mxu1 %v1256_v9  ;;  %s1352_s14 = sshll.u32 %s1428_s21, 4  ;;  %s1353_s14 = int_to_ptr.vmem [resolvable:$false] %s1352_s14 }
  0x7e   : > { %1130 = vmatprep.subr.bf16.mxu0 %v1423_v0  ;;  %1142 = vmatprep.subr.bf16.mxu1 %v1423_v0  ;;  %p1350_p4 = pnand %p1349_p1, %p1613_p6  ;;  %s1354_s30 = scalar_lea.vmem %s1353_s14, 256 }
  0x7f   : > { %753 = vperm.xlu0 %1248, %v492_v14   ;;  %p1355_p12 = scmp.lt.s32.totalorder %s1768_s29, %s1353_s14  ;;  %p1356_p3 = scmp.lt.s32.totalorder %s1354_s30, %s1348_s18 }
  0x80   : > { %927 = vperm.xlu1 %1249, %v925_v38   ;;  %s1766_s19 = scalar_lea.hbm %s1846_s26, %s1101_s12  ;;  %p1351_p8 = pneg %p1350_p4 }
  0x81   : > { %1131 = vmatpush3.bf16.msra.mxu0 %v1253_v6  ;;  %1143 = vmatpush3.bf16.msra.mxu1 %v1257_v10  ;;  %p1357_p7 = por %p1356_p3, %p1355_p12 }
  0x82   : > { %1148 = vmatprep.subr.bf16.mxu0 %v1423_v0  ;;  %1160 = vmatprep.subr.mxu1 %v1423_v0 }
  0x83   : > { %p1358_p10 = pnand %p1357_p7, %p1351_p8 }
  0x84   : > { %1133 = vmatmul.mubr.msk.bf16.vlgmr.msra.gmra.mrb[0].mxu0 %vm532_vm1, %v490_v8 }
  0x85   : > { %1156 = vmatprep.mubr.msk.bf16.mxu0 %vm1424_vm0, %v1423_v0  ;;  %1149 = vmatpush3.bf16.msra.mxu0 %v1258_v11 }
  0x86   : > { %1150 = vmatprep.subr.bf16.mxu0 %v1423_v0 }
  0x89   : > { %1151 = vmatpush3.bf16.msra.mxu0 %v1259_v15 }
  0x8a   : > { %1152 = vmatprep.subr.bf16.mxu0 %v1423_v0 }
  0x8d   : > { %1153 = vmatpush3.bf16.msra.mxu0 %v1260_v33 }
  0x8e   : > { %1154 = vmatprep.subr.bf16.mxu0 %v1423_v0 }
  0x91   : > { %1155 = vmatpush3.bf16.msra.mxu0 %v1261_v36 }
  0xfa   : > { %v748_v28 = vpop.permute.xlu0 %747 }
  0xfb   : > { %vm749_vm4 = vcmp.eq.s32.totalorder %v745_v27, %v748_v28  ;;  %v921_v49 = vpop.permute.xlu1 %920 }
  0xfc   : > { %v1094_v29 = vsel %vm749_vm4, 1.0, %v1423_v0  ;;  %vm922_vm12 = vcmp.eq.s32.totalorder %v921_v49, 1 }
  0xfe   : > { %v754_v30 = vpop.permute.xlu0 %753 }
  0xff   : > { %vm755_vm5 = vcmp.eq.s32.totalorder %v745_v27, %v754_v30  ;;  %v928_v54 = vpop.permute.xlu1 %927 }
 0x100   : > { %v1095_v35 = vsel %vm755_vm5, 1.0, %v1423_v0  ;;  %vm929_vm13 = vcmp.eq.s32.totalorder %v928_v54, 1 }
 0x157   : > { %v570_v17 = vpop.f32.mrb[0].mxu0 }
 0x158   : > { %v571_v18 = vadd.f32 %v1076_v16, %v570_v17  ;;  %v1134_v19 = vpop.f32.mrb[1].mxu0 }
 0x159   : > { %v573_v20 = vpop.f32.mrb[2].mxu0 }
 0x15a   : > { %v576_v21 = vmax.f32 %v571_v18, 0.0  ;;  %v1135_v22 = vpop.f32.mrb[3].mxu0 }
 0x15c   : > { %v577_v23 = vpack.c.bf16 %v576_v21, %v576_v21 }
 0x15e   : > { %1145 = vmatmul.mubr.msk.bf16.vlgmr.msra.gmra.mrb[0].mxu1 %vm532_vm1, %v577_v23 }
 0x15f   : > { %1161 = vmatpush3.msk.msra.mxu1 %vm763_vm2, %v758_v24  ;;  %1162 = vmatprep.mubr.msk.f32.mxu1 %vm1424_vm0, %v1423_v0 }
 0x160   : > { %1172 = vmatprep.subr.bf16.mxu1 %v1426_v26 }
 0x166   : > { %1163 = vmatmul.mubr.msk.f32.vlgmr.msra.gmra.mrb[4].mxu1 %vm759_vm3, %v1094_v29 }
 0x167   : > { %1169 = vmatprep.mubr.msk.f32.mxu1 %vm1424_vm0, %v1423_v0  ;;  %1175 = vmatpush3.bf16.msk.msra.mxu1 %vm1174_vm8, %v1173_v34 }
 0x16a   : > { %1170 = vmatmul.mubr.msk.f32.vlgmr.msra.gmra.mrb[6].mxu1 %vm839_vm9, %v1095_v35 }
 0x231   : > { %v654_v40 = vpop.f32.mrb[0].mxu1 }
 0x232   : > { %v655_v41 = vadd.f32 %v1082_v39, %v654_v40  ;;  %v1146_v42 = vpop.f32.mrb[1].mxu1 }
 0x233   : > { %v657_v43 = vpop.f32.mrb[2].mxu1 }
 0x234   : > { %v660_v44 = vmax.f32 %v655_v41, 0.0  ;;  %v1147_v45 = vpop.f32.mrb[3].mxu1 }
 0x236   : > { %v661_v46 = vpack.c.bf16 %v660_v44, %v660_v44 }
 0x238   : > { %1157 = vmatmul.mubr.msk.bf16.vlgmr.msra.gmra.mrb[4].mxu0 %vm532_vm1, %v661_v46 }
 0x239   : > { %v833_v47 = vpop.f32.mrb[4].mxu1 }
 0x23a   : > { %v1164_v48 = vpop.f32.mrb[5].mxu1 }
 0x23d   : > { %v913_v50 = vpop.f32.mrb[6].mxu1 }
 0x23e   : > { %v923_v51 = vsel %vm922_vm12, %v913_v50, %v833_v47  ;;  %v1171_v52 = vpop.f32.mrb[7].mxu1 }
 0x30b   : > { %v738_v55 = vpop.f32.mrb[4].mxu0 }
 0x30c   : > { %v739_v56 = vadd.f32 %v1088_v53, %v738_v55  ;;  %v1158_v58 = vpop.f32.mrb[5].mxu0 }
 0x30d   : > { %v741_v59 = vpop.f32.mrb[6].mxu0 }
 0x30e   : > { %v930_v60 = vsel %vm929_vm13, %v739_v56, %v923_v51  ;;  %v1159_v61 = vpop.f32.mrb[7].mxu0 }
 0x30f   : > { %v932_v62 = vadd.f32 %v931_v57, %v930_v60 }
 0x311   : > { %934 = vst.msk [vmem:[%s479_s27] sm:$0xff] %vm933_vm14, %v932_v62 }
 0x312   : > { %1361 = shalt.err (!%p1358_p10)
}
 0x313   : > { %s1362_s3 = scalar_lea.hbm %s1766_s19, 128  ;;  %s1366_s27 = scalar_lea.hbm %s1846_s26, 256 }
 0x314   : > { %p1363_p13 = scmp.ne.s32.totalorder %s1766_s19, %s1362_s3  ;;  %p1367_p11 = scmp.lt.u32.totalorder %s1766_s19, %s1846_s26 }
 0x315   : > { %p1368_p9 = scmp.lt.u32.totalorder %s1366_s27, %s1362_s3  ;;  %p1370_p1 = scmp.lt.u32.totalorder %s1362_s3, %s1766_s19 }
 0x316   : > { %p1364_p5 = pnand %p1363_p13, %p1613_p6 }
 0x317   : > { %p1369_p2 = por %p1368_p9, %p1367_p11 }
 0x318   : > { %p1365_p0 = pneg %p1364_p5 }
 0x319   : > { %p1371_p4 = por %p1370_p1, %p1369_p2 }
 0x31b   : > { %p1372_p8 = pnand %p1371_p4, %p1365_p0 }
 0x31d   : > { %1375 = shalt.err (!%p1372_p8)
}
 0x31e   : > { %1186 = dma.vmem_to_hbm [thread:$0]  (%p1613_p6), %s1768_s29, 128, %s1766_s19, %s936_s25  }
 0x31f PF: > { %s1847_s18 = sld [smem:[#allocation12_spill]]  ;;  %s1848_s21 = sld [smem:[#allocation13_spill]] }
 0x320   : > { %p1850_p3 = scmp.ge.s32.totalorder %s1418_s24, 2 }
 0x325   : > { %s961_s14 = sand.u32 1, %s1847_s18   ;;  %p1849_p12 = scmp.ne.s32.totalorder %s1848_s21, 0 }
 0x326   : > { %s962_s30 = scalar_lea.sflag [#allocation4], %s961_s14 }
 0x327   : > { %p1200_p7 = pnand %p1850_p3, %p1849_p12 }
 0x329   : > { %1401 = dma.done.wait (!%p1200_p7), %s962_s30, 128  }
 0x32a   : > { %1403 = vsyncadd (!%p1200_p7), %s962_s30, 4294967168  ;;  %p26_p10 = scmp.ge.s32.totalorder %s1550_s17, 4   ;;  %s1851_s21 = smov %s1410_s22 }
 0x32b   : > { %s1852_s22 = smov %s1414_s23  ;;  %s1853_s23 = smov %s1609_s16 }
 0x32c   : > { %s1854_s24 = smov %s1550_s17  ;;  %28 = sbr.rel (!%p26_p10) target bundleno = 9 (0x9), region = 127 }
 0x333   :  { %967 = vsyncpa [#allocation3], 1 }
 0x334   :  { %969 = vsyncpa [#allocation3 + $0x1], 1 }
 0x335   :  { %970 = vsyncpa [#allocation6], 1 }
 0x336   :  { %971 = vsyncpa [#allocation4], 1 }
 0x337   :  { %973 = vsyncpa [#allocation4 + $0x1], 1 }

</bundles_post_ra>
